<compile_context>
chip_gen: v5e
topology: v5e:2x2
jax: 0.10.0
libtpu: 0.0.40
codegen_flags: <defaults>
</compile_context>

<pallas_src>
import functools

import jax
import jax.numpy as jnp
from jax.experimental import pallas as pl
from jax.experimental.pallas import tpu as pltpu


# ----------------------------------------------------------------------------
# Kernel
# ----------------------------------------------------------------------------
def _gat_kernel(feat_ref, graph_ref, w_ref, out_ref, *, alpha, concat, f_out):
    tb, n, f_in = feat_ref.shape
    f_pad = w_ref.shape[1]

    # hidden_ext = features @ [W | W@a1 | W@a2 | 0] — one fused bf16 MXU matmul
    # (f32 accumulation) over all TB graphs. N is padded to a multiple of 16 in
    # the wrapper, so collapsing (TB, N) -> TB*N is layout-clean.
    hidden_ext = jnp.dot(
        feat_ref[...].reshape(tb * n, f_in), w_ref[...],
        preferred_element_type=jnp.float32).reshape(tb, n, f_pad)

    # Attention logits are two extra columns of the same matmul.
    a1h = hidden_ext[:, :, f_out:f_out + 1]                    # (TB, N, 1)
    a2h = hidden_ext[:, :, f_out + 1:f_out + 2]                # (TB, N, 1)
    e = a1h + jnp.transpose(a2h, (0, 2, 1))                    # (TB, N, N)

    # LeakyReLU (0 <= alpha < 1  =>  max(x, alpha*x)) fused with the adjacency
    # mask: one select over the hottest (N, N) map instead of two.
    e = jnp.where(graph_ref[...] != 0,
                  jnp.maximum(e, jnp.float32(alpha) * e),
                  jnp.float32(-1e9))

    # Numerically stable softmax over neighbours with EXACT normalisation
    # (the approx EUP reciprocal caused the previous reference mismatch).
    e = e - jnp.max(e, axis=-1, keepdims=True)
    p = jnp.exp(e)
    attn = p / jnp.sum(p, axis=-1, keepdims=True)

    # TODO(synk): attention dropout omitted (inference-mode identity).

    # Aggregate neighbour features: bf16 MXU einsum with f32 accumulation.
    # Using the full 128-lane hidden_ext keeps the output block lane-dense
    # (unmasked vst); the two logit columns produce junk that the wrapper
    # slices away.
    h_prime = jnp.einsum(
        "bij,bjo->bio",
        attn.astype(jnp.bfloat16),
        hidden_ext.astype(jnp.bfloat16),
        preferred_element_type=jnp.float32)                    # (TB, N, F_pad)

    if concat:
        # ELU(x) = x if x > 0 else exp(x) - 1
        h_prime = jnp.where(h_prime > 0,
                            h_prime,
                            jnp.exp(jnp.minimum(h_prime, 0.0)) - 1.0)

    out_ref[...] = h_prime.astype(out_ref.dtype)


# ----------------------------------------------------------------------------
# Sizing helpers
# ----------------------------------------------------------------------------
def _physical_vmem_bytes(default=64 * 1024 * 1024):
    """Physical per-core VMEM (v5e/v6e: 128 MiB, v7x: 64 MiB).  Conservative
    (v7x-safe) fallback if the query is unavailable (e.g. interpret mode)."""
    try:
        info = pltpu.get_tpu_info()
        cap = int(getattr(info, "vmem_capacity_bytes", 0))
        if cap > 0:
            return cap
    except Exception:
        pass
    return default


def _choose_block_batch(B, N, F_in, F_pad, vmem_budget):
    """Largest divisor of B that (a) keeps the per-step working set inside the
    generation-aware VMEM budget and (b) leaves >= 4 grid steps (>= 2 minimum)
    so DMA pipelining has work to overlap and v7x's 2nd TensorCore is used."""
    per_graph = (2 * N * F_in * 2          # bf16 features (double-buffered)
                 + 2 * N * N               # int8 adjacency (double-buffered)
                 + 2 * N * F_pad * 4       # f32 output (double-buffered)
                 + 6 * N * N * 4           # e / p / attn intermediates
                 + 3 * N * F_pad * 4)      # hidden_ext (f32 + bf16) / h_prime
    max_tb = max(1, vmem_budget // max(per_graph, 1))

    if B >= 4:
        min_steps = 4
    elif B >= 2:
        min_steps = 2
    else:
        min_steps = 1
    tb_cap = max(1, B // min_steps)

    best = 1
    for tb in range(1, B + 1):
        if B % tb != 0 or tb > max_tb or tb > tb_cap:
            continue
        best = tb
        if tb * N >= 256:                  # enough MXU rows (v5e saturates ~256-512)
            break
    return best


# ----------------------------------------------------------------------------
# Wrapper
# ----------------------------------------------------------------------------
def gat_forward(features, graph, w, a1, a2, *, alpha=0.1, concat=True,
                block_batch=None):
    """features: (B, N, F_in); graph: (B, N, N) int; returns (B, N, F_out) f32."""
    B, N, F_in = features.shape
    F_out = w.shape[1]

    # ---- operand prep (plain XLA, outside the kernel) -----------------------
    # Fold a1/a2 into the projection and pad to a 128-lane multiple so the
    # kernel's hidden/out blocks are lane-dense.
    ext_cols = F_out + 2
    F_pad = ((ext_cols + 127) // 128) * 128
    w_ext = jnp.concatenate(
        [w.astype(jnp.float32),
         (w.astype(jnp.float32) @ a1.astype(jnp.float32)).reshape(F_in, 1),
         (w.astype(jnp.float32) @ a2.astype(jnp.float32)).reshape(F_in, 1),
         jnp.zeros((F_in, F_pad - ext_cols), jnp.float32)],
        axis=1).astype(jnp.bfloat16)                       # bf16 MXU operand

    # Pad N to a multiple of 16 (bf16 sublane packing) so the fused
    # (TB*N, F_in) @ W_ext matmul works for any N.  Padded rows have all-zero
    # adjacency (uniform-softmax garbage) and are sliced off below.
    N_pad = ((N + 15) // 16) * 16
    feat = features.astype(jnp.bfloat16)
    adj = (graph != 0).astype(jnp.int8)                    # 4x smaller than int32
    if N_pad != N:
        feat = jnp.pad(feat, ((0, 0), (0, N_pad - N), (0, 0)))
        adj = jnp.pad(adj, ((0, 0), (0, N_pad - N), (0, N_pad - N)))

    # ---- generation-aware sizing --------------------------------------------
    phys_vmem = _physical_vmem_bytes()
    vmem_budget = int(phys_vmem * 0.375)                   # v5e/v6e ~48 MiB, v7x ~24 MiB
    tb = (block_batch if block_batch is not None
          else _choose_block_batch(B, N_pad, F_in, F_pad, vmem_budget))
    assert B % tb == 0, f"block_batch {tb} must divide batch {B}"

    block_vmem = (2 * tb * N_pad * F_in * 2
                  + 2 * tb * N_pad * N_pad
                  + 2 * tb * N_pad * F_pad * 4
                  + 2 * F_in * F_pad * 2
                  + 6 * tb * N_pad * N_pad * 4
                  + 3 * tb * N_pad * F_pad * 4)
    # Cap at ~85% of the generation's physical VMEM (v7x: 64 MiB part).
    vmem_limit = int(min(max(2 * block_vmem, 32 * 1024 * 1024),
                         int(phys_vmem * 0.85)))

    kernel = functools.partial(_gat_kernel, alpha=float(alpha),
                               concat=bool(concat), f_out=F_out)

    # Advisory cost estimate for XLA's scheduler.
    flops = int(2 * B * N_pad * F_in * F_pad               # feat @ W_ext
                + 2 * B * N_pad * N_pad * F_pad            # attn @ hidden_ext
                + 8 * B * N_pad * N_pad)                   # (N, N) elementwise chain
    transcendentals = int(B * N_pad * N_pad
                          + (B * N_pad * F_pad if concat else 0))
    bytes_accessed = int(2 * B * N_pad * F_in              # bf16 features
                         + B * N_pad * N_pad               # int8 adjacency
                         + 4 * B * N_pad * F_pad           # f32 output
                         + (B // tb) * 2 * F_in * F_pad)   # W_ext per grid step

    out = pl.pallas_call(
        kernel,
        out_shape=jax.ShapeDtypeStruct((B, N_pad, F_pad), jnp.float32),
        grid_spec=pltpu.PrefetchScalarGridSpec(
            num_scalar_prefetch=0,
            grid=(B // tb,),
            in_specs=[
                pl.BlockSpec((tb, N_pad, F_in), lambda g: (g, 0, 0)),   # features (bf16)
                pl.BlockSpec((tb, N_pad, N_pad), lambda g: (g, 0, 0)),  # adjacency (int8)
                pl.BlockSpec((F_in, F_pad), lambda g: (0, 0)),          # W_ext (bf16)
            ],
            out_specs=pl.BlockSpec((tb, N_pad, F_pad), lambda g: (g, 0, 0)),
        ),
        compiler_params=pltpu.CompilerParams(
            dimension_semantics=("parallel",),
            vmem_limit_bytes=vmem_limit),
        cost_estimate=pl.CostEstimate(flops=flops,
                                      transcendentals=transcendentals,
                                      bytes_accessed=bytes_accessed),
    )(feat, adj, w_ext)

    return out[:, :N, :F_out]


# ----------------------------------------------------------------------------
# References & self-test
# ----------------------------------------------------------------------------
def _xavier_uniform(key, shape, gain=1.414):
    fan_in, fan_out = shape[0], shape[1]
    bound = gain * jnp.sqrt(6.0 / (fan_in + fan_out))
    return jax.random.uniform(key, shape, jnp.float32, -bound, bound)


def _reference_f32(features, graph, w, a1, a2, *, alpha=0.1, concat=True):
    """Pure-f32 mirror of the PyTorch module."""
    hidden = jnp.einsum("bnf,fo->bno", features, w)
    a1h = jnp.einsum("bno,oi->bni", hidden, a1)            # (B, N, 1)
    a2h = jnp.einsum("bno,oi->bni", hidden, a2)            # (B, N, 1)
    e = a1h + jnp.swapaxes(a2h, 1, 2)
    e = jnp.where(e > 0, e, alpha * e)
    e = jnp.where(graph == 0, -1e9, e)
    attn = jax.nn.softmax(e, axis=-1)
    h = jnp.einsum("bnm,bmo->bno", attn, hidden)
    if concat:
        h = jnp.where(h > 0, h, jnp.expm1(h))
    return h


def _reference_kernel_math(features, graph, w, a1, a2, *, alpha=0.1, concat=True):
    """Pure-JAX mirror of the kernel's numerics (folded W_ext, bf16 MXU inputs,
    f32 accumulation, exact softmax) — tight check of the kernel math itself."""
    F_in, F_out = w.shape
    w_ext = jnp.concatenate(
        [w, (w @ a1).reshape(F_in, 1), (w @ a2).reshape(F_in, 1)],
        axis=1).astype(jnp.bfloat16).astype(jnp.float32)
    feat = features.astype(jnp.bfloat16).astype(jnp.float32)
    hidden_ext = jnp.einsum("bnf,fo->bno", feat, w_ext)
    hidden = hidden_ext[:, :, :F_out]
    a1h = hidden_ext[:, :, F_out:F_out + 1]
    a2h = hidden_ext[:, :, F_out + 1:F_out + 2]
    e = a1h + jnp.swapaxes(a2h, 1, 2)
    e = jnp.where(graph != 0, jnp.maximum(e, alpha * e), -1e9)
    e = e - jnp.max(e, axis=-1, keepdims=True)
    p = jnp.exp(e)
    attn = p / jnp.sum(p, axis=-1, keepdims=True)
    h = jnp.einsum("bij,bjo->bio",
                   attn.astype(jnp.bfloat16).astype(jnp.float32),
                   hidden.astype(jnp.bfloat16).astype(jnp.float32))
    if concat:
        h = jnp.where(h > 0, h, jnp.exp(jnp.minimum(h, 0.0)) - 1.0)
    return h


if __name__ == "__main__":
    B, N, F_IN, F_OUT = 8, 16, 32, 64
    ALPHA = 0.1

    key = jax.random.PRNGKey(0)
    k_feat, k_graph, k_w, k_a1, k_a2 = jax.random.split(key, 5)

    features = jax.random.normal(k_feat, (B, N, F_IN), dtype=jnp.float32)
    # random adjacency with self-loops so every row has at least one edge
    graph = (jax.random.uniform(k_graph, (B, N, N)) > 0.5).astype(jnp.int32)
    graph = jnp.maximum(graph, jnp.eye(N, dtype=jnp.int32)[None])

    w = _xavier_uniform(k_w, (F_IN, F_OUT))
    a1 = _xavier_uniform(k_a1, (F_OUT, 1))
    a2 = _xavier_uniform(k_a2, (F_OUT, 1))

    out = gat_forward(features, graph, w, a1, a2, alpha=ALPHA, concat=True)
    out = jax.block_until_ready(out)

    assert out.shape == (B, N, F_OUT)
    assert bool(jnp.all(jnp.isfinite(out)))

    # (1) Tight check against a pure-JAX reference that mirrors the kernel's
    #     own numerics (same folded W_ext, same bf16 MXU casts, exact softmax):
    #     validates the kernel implementation itself.
    ref_k = _reference_kernel_math(features, graph, w, a1, a2,
                                   alpha=ALPHA, concat=True)
    assert jnp.allclose(out, ref_k, atol=2e-2, rtol=2e-2), (
        "kernel does not match its own (bf16-matched) reference math")

    # (2) Looser check against the f32 PyTorch-faithful reference.  The v2
    #     mismatch (approx softmax reciprocal) is fixed — the remaining gap is
    #     solely the deliberate bf16 MXU casts requested by the perf review.
    ref_f32 = _reference_f32(features, graph, w, a1, a2,
                             alpha=ALPHA, concat=True)
    assert jnp.allclose(out, ref_f32, atol=1e-1, rtol=1e-1), (
        "kernel deviates from the f32 reference beyond bf16 tolerance")

    print("KERNEL_OK")
</pallas_src>

<mosaic_0001>
module attributes {stable_mosaic.version = 11 : i64} {
  func.func @_gat_kernel(%arg0: i32, %arg1: memref<2x16x32xbf16, #tpu.memory_space<vmem>>, %arg2: memref<2x16x16xi8, #tpu.memory_space<vmem>>, %arg3: memref<32x128xbf16, #tpu.memory_space<vmem>>, %arg4: memref<2x16x128xf32, #tpu.memory_space<vmem>>) attributes {dimension_semantics = [#tpu.dimension_semantics<parallel>], iteration_bounds = array<i64: 4>, scalar_prefetch = 0 : i64, scratch_operands = 0 : i64, tpu.core_type = #tpu.core_type<tc>, window_params = [{transform_indices = @transform_0, window_bounds = array<i64: 2, 16, 32>}, {transform_indices = @transform_1, window_bounds = array<i64: 2, 16, 16>}, {pipeline_mode = #tpu.pipeline_mode<synchronous>, transform_indices = @transform_2, window_bounds = array<i64: 32, 128>}, {transform_indices = @transform_3, window_bounds = array<i64: 2, 16, 128>}]} {
    %c0 = arith.constant 0 : index
    %c0_0 = arith.constant 0 : index
    %c0_1 = arith.constant 0 : index
    %0 = vector.load %arg1[%c0, %c0_0, %c0_1] : memref<2x16x32xbf16, #tpu.memory_space<vmem>>, vector<2x16x32xbf16>
    %1 = vector.shape_cast %0 : vector<2x16x32xbf16> to vector<32x32xbf16>
    %c0_2 = arith.constant 0 : index
    %c0_3 = arith.constant 0 : index
    %2 = vector.load %arg3[%c0_2, %c0_3] : memref<32x128xbf16, #tpu.memory_space<vmem>>, vector<32x128xbf16>
    %cst = arith.constant dense<0.000000e+00> : vector<32x128xf32>
    %3 = tpu.matmul %1, %2, %cst {dimension_numbers = #tpu.dot_dimension_numbers<[1], [0], [0], [1], [0, 0, 1, 1], [], []>} : vector<32x32xbf16>, vector<32x128xbf16>, vector<32x128xf32> -> vector<32x128xf32>
    %4 = vector.shape_cast %3 : vector<32x128xf32> to vector<2x16x128xf32>
    %5 = vector.extract_strided_slice %4 {offsets = [0, 0, 64], sizes = [2, 16, 1], strides = [1, 1, 1]} : vector<2x16x128xf32> to vector<2x16x1xf32>
    %6 = vector.extract_strided_slice %4 {offsets = [0, 0, 65], sizes = [2, 16, 1], strides = [1, 1, 1]} : vector<2x16x128xf32> to vector<2x16x1xf32>
    %7 = tpu.transpose %6, [0, 2, 1] : vector<2x16x1xf32> -> vector<2x1x16xf32>
    %8 = vector.broadcast %5 : vector<2x16x1xf32> to vector<2x16x16xf32>
    %9 = vector.broadcast %7 : vector<2x1x16xf32> to vector<2x16x16xf32>
    %10 = arith.addf %8, %9 : vector<2x16x16xf32>
    %c0_4 = arith.constant 0 : index
    %c0_5 = arith.constant 0 : index
    %c0_6 = arith.constant 0 : index
    %11 = vector.load %arg2[%c0_4, %c0_5, %c0_6] : memref<2x16x16xi8, #tpu.memory_space<vmem>>, vector<2x16x16xi8>
    %c0_i8 = arith.constant 0 : i8
    %12 = vector.broadcast %c0_i8 : i8 to vector<2x16x16xi8>
    %13 = arith.cmpi ne, %11, %12 : vector<2x16x16xi8>
    %cst_7 = arith.constant 1.000000e-01 : f32
    %14 = vector.broadcast %cst_7 : f32 to vector<2x16x16xf32>
    %15 = arith.mulf %14, %10 : vector<2x16x16xf32>
    %16 = arith.maximumf %10, %15 : vector<2x16x16xf32>
    %cst_8 = arith.constant -1.000000e+09 : f32
    %17 = vector.broadcast %cst_8 : f32 to vector<2x16x16xf32>
    %18 = arith.select %13, %16, %17 : vector<2x16x16xi1>, vector<2x16x16xf32>
    %cst_9 = arith.constant dense<0xFF800000> : vector<2x16xf32>
    %19 = vector.multi_reduction <maximumf>, %18, %cst_9 [2] : vector<2x16x16xf32> to vector<2x16xf32>
    %20 = vector.shape_cast %19 : vector<2x16xf32> to vector<2x16x1xf32>
    %21 = vector.broadcast %20 : vector<2x16x1xf32> to vector<2x16x16xf32>
    %22 = arith.subf %18, %21 : vector<2x16x16xf32>
    %23 = math.exp %22 : vector<2x16x16xf32>
    %cst_10 = arith.constant dense<0.000000e+00> : vector<2x16xf32>
    %24 = vector.multi_reduction <add>, %23, %cst_10 [2] : vector<2x16x16xf32> to vector<2x16xf32>
    %25 = vector.shape_cast %24 : vector<2x16xf32> to vector<2x16x1xf32>
    %26 = vector.broadcast %25 : vector<2x16x1xf32> to vector<2x16x16xf32>
    %27 = arith.divf %23, %26 : vector<2x16x16xf32>
    %28 = arith.truncf %27 : vector<2x16x16xf32> to vector<2x16x16xbf16>
    %29 = arith.truncf %4 : vector<2x16x128xf32> to vector<2x16x128xbf16>
    "tpu.trace_start"() <{level = 10 : i32, message = "bij,bjo->bio"}> : () -> ()
    %cst_11 = arith.constant dense<0.000000e+00> : vector<2x16x128xf32>
    %30 = tpu.matmul %28, %29, %cst_11 {dimension_numbers = #tpu.dot_dimension_numbers<[2], [1], [1], [2], [0, 0, 0, 1, 1, 2], [0], [0]>} : vector<2x16x16xbf16>, vector<2x16x128xbf16>, vector<2x16x128xf32> -> vector<2x16x128xf32>
    %cst_12 = arith.constant 0.000000e+00 : f32
    "tpu.trace_stop"() : () -> ()
    %31 = vector.broadcast %cst_12 : f32 to vector<2x16x128xf32>
    %32 = arith.cmpf ogt, %30, %31 : vector<2x16x128xf32>
    %cst_13 = arith.constant 0.000000e+00 : f32
    %33 = vector.broadcast %cst_13 : f32 to vector<2x16x128xf32>
    %34 = arith.minimumf %30, %33 : vector<2x16x128xf32>
    %35 = math.exp %34 : vector<2x16x128xf32>
    %cst_14 = arith.constant 1.000000e+00 : f32
    %36 = vector.broadcast %cst_14 : f32 to vector<2x16x128xf32>
    %37 = arith.subf %35, %36 : vector<2x16x128xf32>
    %38 = arith.select %32, %30, %37 : vector<2x16x128xi1>, vector<2x16x128xf32>
    %c0_15 = arith.constant 0 : index
    %c0_16 = arith.constant 0 : index
    %c0_17 = arith.constant 0 : index
    %39 = vector.load %arg4[%c0_15, %c0_16, %c0_17] : memref<2x16x128xf32, #tpu.memory_space<vmem>>, vector<2x16x128xf32>
    tpu.vector_store %arg4[%c0_15, %c0_16, %c0_17], %38 {strides = array<i32>} : memref<2x16x128xf32, #tpu.memory_space<vmem>>, vector<2x16x128xf32>,
    return
  }
  func.func @transform_0(%arg0: i32) -> (i32, i32, i32) {
    %c0_i32 = arith.constant 0 : i32
    %c0_i32_0 = arith.constant 0 : i32
    %c0_i32_1 = arith.constant 0 : i32
    return %arg0, %c0_i32, %c0_i32_0 : i32, i32, i32
  }
  func.func @transform_1(%arg0: i32) -> (i32, i32, i32) {
    %c0_i32 = arith.constant 0 : i32
    %c0_i32_0 = arith.constant 0 : i32
    %c0_i32_1 = arith.constant 0 : i32
    return %arg0, %c0_i32, %c0_i32_0 : i32, i32, i32
  }
  func.func @transform_2(%arg0: i32) -> (i32, i32) {
    %c0_i32 = arith.constant 0 : i32
    %c0_i32_0 = arith.constant 0 : i32
    %c0_i32_1 = arith.constant 0 : i32
    return %c0_i32, %c0_i32_0 : i32, i32
  }
  func.func @transform_3(%arg0: i32) -> (i32, i32, i32) {
    %c0_i32 = arith.constant 0 : i32
    %c0_i32_0 = arith.constant 0 : i32
    %c0_i32_1 = arith.constant 0 : i32
    return %arg0, %c0_i32, %c0_i32_0 : i32, i32, i32
  }
}

</mosaic_0001>

<bundles_post_ra>
// kernel: tpu_custom_call.1
= control target key start
LH: loop header
LB: loop body
LE: loop exit
PB: predicated region body
PF: predicated region fallthrough
CT: control target
= control target key end

     0   :  { %s1317_s0 = inlined_call_operand.hbm [shape: bf16[8,16,32], index: 0, kind: input, shape index: {}]   ;;  %s1318_s1 = inlined_call_operand.hbm [shape: s8[8,16,16], index: 1, kind: input, shape index: {}]   ;;  %s1319_s2 = inlined_call_operand.hbm [shape: bf16[32,128], index: 2, kind: input, shape index: {}]   ;;  %s1320_s3 = inlined_call_operand.hbm [shape: f32[8,16,128], index: 3, kind: output, shape index: {}]  }
   0x1   :  { %1322 = sst [smem:[#allocation14_spill]] %s1319_s2 }
   0x2   :  { %8 = vsyncpa [#allocation3], 0 }
   0x3   :  { %10 = vsyncpa [#allocation3 + $0x1], 0 }
   0x4   :  { %11 = vsyncpa [#allocation6], 0 }
   0x5   :  { %13 = vsyncpa [#allocation6 + $0x1], 0 }
   0x6   :  { %14 = vsyncpa [#allocation4], 0 }
   0x7   :  { %16 = vsyncpa [#allocation4 + $0x1], 0  ;;  %s1112_s12 = smov 0   ;;  %s1114_s13 = smov 0  }
   0x8   :  { %s1116_s14 = smov 0   ;;  %s1118_s15 = smov 0  }
   0x9 LB: > { %s1133_s16 = sadd.s32 4294967295, %s1080_s15   ;;  %s758_s17 = sadd.s32 4294967294, %s1080_s15   ;;  %s1080_s15 = sphi %s1118_s15, %s1337_s15   ;;  %s1076_s14 = sphi %s1116_s14, %s1336_s14   ;;  %s1072_s13 = sphi %s1114_s13, %s1335_s13   ;;  %s1068_s12 = sphi %s1112_s12, %s1334_s12  }
   0xa   : > { %p42_p0 = scmp.ne.s32.totalorder %s1072_s13, %s1068_s12  ;;  %p43_p1 = scmp.eq.s32.totalorder %s1133_s16, 0 }
   0xb   : > { %p113_p2 = scmp.eq.s32.totalorder %s1133_s16, 3  ;;  %p119_p3 = scmp.eq.s32.totalorder %s758_s17, 3 }
   0xc   : > { %p1142_p4 = por %p43_p1, %p42_p0  ;;  %p759_p5 = scmp.ge.s32.totalorder %s1080_s15, 1 }
   0xd   : > { %p1147_p6 = por %p119_p3, %p42_p0  ;;  %p126_p7 = scmp.lt.s32.totalorder %s1080_s15, 5 }
   0xe   : > { %s1325_s2 = sld [smem:[#allocation14_spill]]  ;;  %s1082_s24 = smov [#allocation7]  }
   0xf   : > { %p1155_p8 = pnand %p759_p5, %p126_p7  ;;  %s139_s25 = sshll.u32 %s1082_s24, 4  ;;  %s140_s25 = int_to_ptr.vmem [resolvable:$true] %s139_s25 }
  0x10   : > { %s1164_s26 = sadd.s32 1, %s1080_s15   ;;  %s1321_s27 = smov 64  }
  0x11   : > { %p827_p9 = pneg %p1155_p8  ;;  %s1084_s28 = smov 4  }
  0x12   : > { %s26_s29 = ssub.s32 %s1080_s15, %s1164_s26  ;;  %s29_s30 = sadd.s32 1, %s1076_s14 }
  0x13   : > { %p828_p10 = pnand %p827_p9, %p43_p1  ;;  %p27_p11 = scmp.eq.s32.totalorder %s26_s29, 0 }
  0x14   : > { %s137_s22 = sshll.u32 %s1325_s2, 4  ;;  %p36_p12 = scmp.ne.s32.totalorder %s1076_s14, %s1072_s13  ;;  %s138_s22 = int_to_ptr.hbm [resolvable:$true] %s137_s22 }
  0x15   : > { %830 = dma.hbm_to_vmem [thread:$0]  (!%p828_p10), %s138_s22, 256, %s140_s25, [#allocation6], %s1321_s27, %s1321_s27, %s1084_s28  }
  0x16   : > { %p37_p13 = scmp.eq.s32.totalorder %s1080_s15, 0  ;;  %p843_p0 = scmp.lt.s32.totalorder %s1080_s15, 4 }
  0x17   : > { %s1177_s4 = scalar_select %p27_p11, %s1076_s14, %s29_s30  }
  0x18   : > { %p38_p3 = por %p37_p13, %p36_p12  ;;  %p1181_p5 = por %p113_p2, %p36_p12 }
  0x19   : > { %1327 = sst [smem:[#allocation13_spill]] %s1177_s4  ;;  %s1186_s6 = sand.u32 1, %s1076_s14  }
  0x1a   : > { %s806_s7 = sshll.u32 %s1080_s15, 4  ;;  %s762_s8 = sshll.u32 %s1186_s6, 4 }
  0x1b   : > { %s163_s11 = scalar_lea.hbm %s1317_s0, %s806_s7  ;;  %s157_s20 = scalar_lea.vmem [#allocation2], %s762_s8 }
  0x1c   : > { %s164_s17 = sshll.u32 %s163_s11, 4  ;;  %s166_s21 = sshll.u32 %s157_s20, 4  ;;  %s165_s17 = int_to_ptr.hbm [resolvable:$true] %s164_s17  ;;  %s167_s21 = int_to_ptr.vmem [resolvable:$true] %s166_s21 }
  0x1d   : > { %p1195_p2 = pnand %p843_p0, %p38_p3  ;;  %s176_s24 = sand.u32 1, %s1080_s15  }
  0x1e   : > { %s766_s25 = sshll.u32 %s1186_s6, 3  ;;  %s154_s29 = scalar_lea.sflag [#allocation3], %s1186_s6 }
  0x1f   : > { %s946_s30 = sshra.s32 %s165_s17, 4  ;;  %p950_p9 = pneg %p1195_p2  ;;  %s947_s30 = int_to_ptr.hbm [resolvable:$true] %s946_s30 }
  0x20   : > { %s948_s27 = scalar_lea.hbm %s947_s30, 16  ;;  %s953_s9 = scalar_lea.hbm %s1317_s0, 64 }
  0x21   : > { %p949_p7 = scmp.ne.s32.totalorder %s947_s30, %s948_s27  ;;  %p954_p12 = scmp.lt.s32.totalorder %s947_s30, %s1317_s0 }
  0x22   : > { %p955_p13 = scmp.lt.s32.totalorder %s953_s9, %s948_s27 }
  0x23   : > { %p951_p10 = pnand %p950_p9, %p949_p7 }
  0x24   : > { %p956_p0 = por %p955_p13, %p954_p12 }
  0x25   : > { %p952_p11 = pneg %p951_p10 }
  0x27   : > { %p957_p3 = pnand %p956_p0, %p952_p11 }
  0x29   : > { %960 = shalt.err (!%p957_p3)
}
  0x2a   : > { %s1330_s6 = smov 64   ;;  %s808_s20 = sshll.u32 %s1080_s15, 3 }
  0x2b   : > { %834 = dma.hbm_to_vmem [thread:$0]  (!%p1195_p2), %s165_s17, 256, %s167_s21, %s154_s29, %s1330_s6, %s1330_s6, %s1084_s28  }
  0x2c   : > { %s180_s2 = scalar_lea.vmem [#allocation5], %s766_s25  ;;  %s186_s10 = scalar_lea.hbm %s1318_s1, %s808_s20 }
  0x2d   : > { %s189_s7 = sshll.u32 %s180_s2, 4  ;;  %s187_s27 = sshll.u32 %s186_s10, 4  ;;  %s190_s7 = int_to_ptr.vmem [resolvable:$true] %s189_s7  ;;  %s188_s27 = int_to_ptr.hbm [resolvable:$true] %s187_s27 }
  0x2e   : > { %s177_s30 = scalar_lea.sflag [#allocation6], %s176_s24  ;;  %s976_s9 = sshra.s32 %s188_s27, 4  ;;  %s977_s9 = int_to_ptr.hbm [resolvable:$true] %s976_s9 }
  0x2f   : > { %s978_s11 = scalar_lea.hbm %s977_s9, 8  ;;  %s983_s2 = scalar_lea.hbm %s1318_s1, 32 }
  0x30   : > { %p979_p7 = scmp.ne.s32.totalorder %s977_s9, %s978_s11  ;;  %p984_p12 = scmp.lt.s32.totalorder %s977_s9, %s1318_s1 }
  0x31   : > { %p985_p13 = scmp.lt.s32.totalorder %s983_s2, %s978_s11 }
  0x32   : > { %p981_p10 = pnand %p979_p7, %p950_p9 }
  0x33   : > { %p986_p0 = por %p985_p13, %p984_p12 }
  0x34   : > { %p982_p11 = pneg %p981_p10 }
  0x36   : > { %p987_p3 = pnand %p986_p0, %p982_p11 }
  0x38   : > { %990 = shalt.err (!%p987_p3)
}
  0x39   : > { %s1085_s4 = smov 32   ;;  %s1086_s24 = smov 2  }
  0x3a   : > { %837 = dma.hbm_to_vmem [thread:$0]  (!%p1195_p2), %s188_s27, 128, %s190_s7, %s177_s30, %s1085_s4, %s1085_s4, %s1086_s24  }
  0x3b   : > { %201 = sbr.rel (%p1155_p8) target bundleno = 934 (0x3a6), region = 32  ;;  %s1236_s29 = sand.u32 (!%p1155_p8), 1, %s1072_s13  }
  0x3c   : > { %s771_s6 = sshll.u32 (!%p1155_p8), %s1236_s29, 4  ;;  %s204_s20 = scalar_lea.sflag (!%p1155_p8), [#allocation3], %s1236_s29 }
  0x3d   : > { %s207_s8 = scalar_lea.vmem (!%p1155_p8), [#allocation2], %s771_s6 }
  0x40   : > { %1051 = dma.done.wait (%p1142_p4), %s204_s20, 256  }
  0x41   : > { %1053 = vsyncadd (%p1142_p4), %s204_s20, 4294967040  ;;  %s213_s22 = sand.u32 1, %s1133_s16   ;;  %s772_s23 = sshll.u32 %s1236_s29, 3 }
  0x42   : > { %s214_s7 = scalar_lea.sflag [#allocation6], %s213_s22  ;;  %s1246_s10 = scalar_lea.vmem [#allocation5], %s772_s23 }
  0x43   : > { %1055 = dma.done.wait (%p1142_p4), %s214_s7, 128  }
  0x44   : > { %1057 = vsyncadd (%p1142_p4), %s214_s7, 4294967168 }
  0x45   : > { %1059 = dma.done.wait (%p43_p1), [#allocation6], 256  }
  0x46   : > { %1061 = vsyncadd (%p43_p1), [#allocation6], 4294967040  ;;  %v812_v0 = vld [vmem:[#allocation7 + $0x8] sm:$0xff]  ;;  %v811_v1 = vld [vmem:[#allocation7] sm:$0xff]  ;;  %vm287_vm0 = vcmask 261120   ;;  %v1087_v4 = vmov 64  }
  0x47   : > { %300 = vmatpush.bf16.msra.mxu0 %v812_v0  ;;  %815 = vmatpush.bf16.msra.mxu3 %v812_v0  ;;  %v809_v2 = vld [vmem:[%s207_s8] sm:$0xff]  ;;  %v810_v3 = vld [vmem:[%s207_s8 + $0x8] sm:$0xff]  ;;  %s1088_s18 = smov 63   ;;  %v1089_v28 = vmov 0   ;;  %vm447_vm6 = vcmask 130048   ;;  %s774_s27 = sshll.u32 %s1236_s29, 5 }
  0x48   : > { %889 = vset.pattern.permute.xlu2 %v1087_v4  ;;  %891 = vset.pattern.permute.xlu1 %v1087_v4  ;;  %v418_v25 = vld [vmem:[%s1246_s10 + $0x6] sm:$0x3]  ;;  %v417_v26 = vld [vmem:[%s1246_s10 + $0x4] sm:$0x3]  ;;  %v415_v31 = vld [vmem:[%s1246_s10] sm:$0x3] }
  0x49   : > { %890 = vset.pattern.permute.xlu0 %v1087_v4  ;;  %vm422_vm1 = vnez %v418_v25  ;;  %vm421_vm2 = vnez %v417_v26  ;;  %vm419_vm3 = vnez %v415_v31  ;;  %v416_v46 = vld [vmem:[%s1246_s10 + $0x2] sm:$0x3]  ;;  %s814_s30 = sshll.u32 %s1133_s16, 5  ;;  %s250_s9 = scalar_lea.vmem [#allocation8], %s774_s27 }
  0x4a   : > { %v434_v29 = vsel %vm422_vm1, 16843009, %v1089_v28  ;;  %v433_v30 = vsel %vm421_vm2, 16843009, %v1089_v28  ;;  %v431_v41 = vsel %vm419_vm3, 16843009, %v1089_v28  ;;  %vm420_vm7 = vnez %v416_v46  ;;  %s649_s17 = scalar_lea.hbm %s1320_s3, %s814_s30 }
  0x4b   : > { %301 = vmatpush.bf16.msra.mxu0 %v811_v1  ;;  %816 = vmatpush.bf16.msra.mxu3 %v811_v1  ;;  %v438_v34 = vunpack.c.0.s8 %v434_v29  ;;  %v437_v35 = vunpack.c.0.s8 %v433_v30  ;;  %v435_v48 = vunpack.c.0.s8 %v431_v41  ;;  %v432_v56 = vsel %vm420_vm7, 16843009, %v1089_v28  ;;  %s650_s2 = sshll.u32 %s250_s9, 4  ;;  %s652_s21 = sshll.u32 %s649_s17, 4  ;;  %s651_s2 = int_to_ptr.vmem [resolvable:$true] %s650_s2  ;;  %s653_s21 = int_to_ptr.hbm [resolvable:$true] %s652_s21 }
  0x4c   : > { %v436_v59 = vunpack.c.0.s8 %v432_v56  ;;  %s637_s16 = scalar_lea.sflag [#allocation4], %s1236_s29  ;;  %s1020_s25 = sshra.s32 %s653_s21, 4  ;;  %s1021_s25 = int_to_ptr.hbm [resolvable:$true] %s1020_s25 }
  0x4d   : > { %vm442_vm4 = vcmp.ne.s32.totalorder %v438_v34, 0  ;;  %vm441_vm5 = vcmp.ne.s32.totalorder %v437_v35, 0  ;;  %vm439_vm8 = vcmp.ne.s32.totalorder %v435_v48, 0  ;;  %s1022_s4 = scalar_lea.hbm %s1021_s25, 32  ;;  %s1026_s20 = scalar_lea.hbm %s1320_s3, 128 }
  0x4e   : > { %791 = vmatmul.msk.bf16.vlgmr.msra.gmra.mxu0 %vm287_vm0, %v809_v2  ;;  %792 = vmatmul.msk.bf16.vlgmr.msra.gmra.mxu3 %vm287_vm0, %v810_v3  ;;  %vm440_vm9 = vcmp.ne.s32.totalorder %v436_v59, 0  ;;  %p1023_p1 = scmp.ne.s32.totalorder %s1021_s25, %s1022_s4  ;;  %p1027_p2 = scmp.lt.s32.totalorder %s1021_s25, %s1320_s3 }
  0x4f   : > { %p1028_p9 = scmp.lt.s32.totalorder %s1026_s20, %s1022_s4 }
  0x50   : > { %p1024_p4 = pnand %p1023_p1, %p1181_p5 }
  0x51   : > { %p1029_p7 = por %p1028_p9, %p1027_p2 }
  0x52   : > { %p1025_p8 = pneg %p1024_p4 }
  0x54   : > { %p1030_p10 = pnand %p1029_p7, %p1025_p8 }
  0xcb   : > { %v303_v5 = vpop.f32.mrf.mxu0 }
  0xcc   : > { %317 = vrot.lane.b32.xlu1 %v303_v5, %s1088_s18  ;;  %v548_v7 = vpack.c.bf16 %v303_v5, %v303_v5 }
  0xce   : > { %v559_v10 = vunpack.c.l.b16 %v548_v7 }
  0xd1   : > { %v308_v6 = vpop.f32.mrf.mxu3 }
  0xd2   : > { %402 = vperm.xlu2 %889, %v308_v6   ;;  %321 = vrot.lane.b32.xlu0 %v308_v6, %s1088_s18  ;;  %v550_v13 = vpack.c.bf16 %v308_v6, %v308_v6 }
  0xd3   : > { %v305_v8 = vpop.f32.mrf.mxu0 }
  0xd4   : > { %v549_v9 = vpack.c.bf16 %v305_v8, %v305_v8  ;;  %319 = vrot.lane.b32.xlu1 %v305_v8, %s1088_s18  ;;  %v587_v16 = vunpack.c.l.b16 %v550_v13 }
  0xd6   : > { %v560_v11 = vunpack.c.l.b16 %v549_v9 }
  0xd8   : > { %v561_v12 = vpack.c.b16 %v560_v11, %v559_v10 }
  0xd9   : > { %v310_v14 = vpop.f32.mrf.mxu3 }
  0xda   : > { %v551_v15 = vpack.c.bf16 %v310_v14, %v310_v14  ;;  %406 = vperm.xlu2 %889, %v310_v14   ;;  %323 = vrot.lane.b32.xlu0 %v310_v14, %s1088_s18 }
  0xdb   : > { %573 = vmatpush.bf16.msra.mxu1 %v561_v12 }
  0xdc   : > { %398 = vperm.xlu1 %891, %v305_v8   ;;  %v588_v17 = vunpack.c.l.b16 %v551_v15 }
  0xde   : > { %v589_v18 = vpack.c.b16 %v588_v17, %v587_v16 }
  0xe0   : > { %601 = vmatpush.bf16.msra.mxu2 %v589_v18 }
  0xe2   : > { %394 = vperm.xlu0 %890, %v303_v5  }
 0x12c   : > { %v403_v23 = vpop.permute.xlu2 %402 }
 0x134   : > { %v407_v24 = vpop.permute.xlu2 %406 }
 0x13e   : > { %v318_v19 = vpop.permute.xlu1 %317 }
 0x13f   : > { %329 = vxpose.xlu1.b32.start [1/2] (short) (narrow) %v318_v19, 8 }
 0x144   : > { %v322_v20 = vpop.permute.xlu0 %321 }
 0x145   : > { %361 = vxpose.xlu2.b32.start [1/2] (short) (narrow) %v322_v20, 8 }
 0x146   : > { %v320_v21 = vpop.permute.xlu1 %319 }
 0x147   : > { %330 = vxpose.xlu1.b32.end [2/2] (short) (narrow) %v320_v21, 8 }
 0x14c   : > { %v324_v22 = vpop.permute.xlu0 %323 }
 0x14d   : > { %362 = vxpose.xlu2.b32.end [2/2] (short) (narrow) %v324_v22, 8 }
 0x14e   : > { %v399_v27 = vpop.permute.xlu1 %398 }
 0x154   : > { %v395_v43 = vpop.permute.xlu0 %394 }
 0x1de   : > { %v377_v32 = vpop.trf.xlu2 }
 0x1df   : > { %v410_v33 = vperm.slane %v377_v32, 0 }
 0x1e1   : > { %v413_v36 = vadd.f32 %v410_v33, %v403_v23  ;;  %v414_v37 = vadd.f32 %v410_v33, %v407_v24 }
 0x1e3   : > { %v425_v38 = vmul.f32 0.1, %v413_v36  ;;  %v426_v39 = vmul.f32 0.1, %v414_v37  ;;  %v345_v40 = vpop.trf.xlu1 }
 0x1e4   : > { %v409_v42 = vperm.slane %v345_v40, 0 }
 0x1e5   : > { %v430_v44 = vmax.f32 %v414_v37, %v426_v39  ;;  %v429_v45 = vmax.f32 %v413_v36, %v425_v38 }
 0x1e6   : > { %v411_v47 = vadd.f32 %v409_v42, %v395_v43  ;;  %v412_v54 = vadd.f32 %v409_v42, %v399_v27 }
 0x1e7   : > { %v446_v49 = vsel %vm442_vm4, %v430_v44, -1e+09  ;;  %v445_v50 = vsel %vm441_vm5, %v429_v45, -1e+09 }
 0x1e8   : > { %v423_v51 = vmul.f32 0.1, %v411_v47  ;;  %v457_v52 = vsel %vm447_vm6, %v446_v49, -inf  ;;  %v454_v53 = vsel %vm447_vm6, %v445_v50, -inf  ;;  %v424_v57 = vmul.f32 0.1, %v412_v54 }
 0x1e9   : > { %458 = vmax.xlane.f32.xlu2 %v457_v52  ;;  %455 = vmax.xlane.f32.xlu0 %v454_v53 }
 0x1ea   : > { %v427_v55 = vmax.f32 %v411_v47, %v423_v51  ;;  %v428_v61 = vmax.f32 %v412_v54, %v424_v57 }
 0x1ec   : > { %v443_v58 = vsel %vm439_vm8, %v427_v55, -1e+09  ;;  %v444_v62 = vsel %vm440_vm9, %v428_v61, -1e+09 }
 0x1ed   : > { %v448_v60 = vsel %vm447_vm6, %v443_v58, -inf  ;;  %v451_v63 = vsel %vm447_vm6, %v444_v62, -inf }
 0x1f1   : > { %449 = vmax.xlane.f32.xlu0 %v448_v60 }
 0x1f9   : > { %452 = vmax.xlane.f32.xlu0 %v451_v63 }
 0x25c   : > { %v456_v0 = vpop.xlane.xlu0 %455  ;;  %v459_v3 = vpop.xlane.xlu2 %458 }
 0x25d   : > { %v462_v1 = vsub.f32 %v445_v50, %v456_v0  ;;  %v463_v6 = vsub.f32 %v446_v49, %v459_v3 }
 0x25f   : > { %v468_v2 = vmul.f32 1.442695, %v462_v1  ;;  %v470_v10 = vmul.f32 1.442695, %v463_v6 }
 0x261   : > { %892 = vpow2.f32 %v468_v2 }
 0x264   : > { %v450_v4 = vpop.xlane.xlu0 %449 }
 0x265   : > { %v460_v5 = vsub.f32 %v443_v58, %v450_v4 }
 0x267   : > { %v464_v7 = vmul.f32 1.442695, %v460_v5  ;;  %v893_v8 = vpop.eup %892 }
 0x268   : > { %v478_v9 = vsel %vm447_vm6, %v893_v8, 0.0 }
 0x269   : > { %894 = vpow2.f32 %v464_v7  ;;  %479 = vadd.xlane.f32.xlu1 %v478_v9 }
 0x26a   : > { %896 = vpow2.f32 %v470_v10 }
 0x26c   : > { %v453_v11 = vpop.xlane.xlu0 %452 }
 0x26d   : > { %v461_v13 = vsub.f32 %v444_v62, %v453_v11 }
 0x26f   : > { %v1265_v12 = vpop.eup %894  ;;  %v466_v15 = vmul.f32 1.442695, %v461_v13 }
 0x270   : > { %v472_v14 = vsel %vm447_vm6, %v1265_v12, 0.0  ;;  %v897_v16 = vpop.eup %896 }
 0x271   : > { %473 = vadd.xlane.f32.xlu0 %v472_v14  ;;  %898 = vpow2.f32 %v466_v15  ;;  %v481_v17 = vsel %vm447_vm6, %v897_v16, 0.0 }
 0x277   : > { %v1270_v18 = vpop.eup %898 }
 0x278   : > { %v475_v19 = vsel %vm447_vm6, %v1270_v18, 0.0 }
 0x279   : > { %482 = vadd.xlane.f32.xlu0 %v481_v17 }
 0x281   : > { %476 = vadd.xlane.f32.xlu0 %v475_v19 }
 0x2dc   : > { %v480_v20 = vpop.xlane.xlu1 %479 }
 0x2dd   : > { %900 = vrcp.f32 %v480_v20  ;;  %v525_v30 = vand.u32 2147483648, %v480_v20  ;;  %vm519_vm11 = vweird.f32 %v480_v20  ;;  %v523_v32 = vand.u32 2147483647, %v480_v20 }
 0x2df   : > { %v526_v35 = vor.u32 1.1754944e-38, %v525_v30  ;;  %vm524_vm13 = vcmp.eq.f32.partialorder %v523_v32, 8.507059e+37 }
 0x2e3   : > { %v901_v21 = vpop.eup %900 }
 0x2e4   : > { %v474_v22 = vpop.xlane.xlu0 %473  ;;  %v515_v23 = vmul.f32 %v901_v21, %v480_v20  ;;  %vm520_vm10 = vweird.f32 %v901_v21 }
 0x2e5   : > { %902 = vrcp.f32 %v474_v22  ;;  %vm521_vm12 = vmor %vm519_vm11, %vm520_vm10  ;;  %vm489_vm0 = vweird.f32 %v474_v22  ;;  %v495_v45 = vand.u32 2147483648, %v474_v22  ;;  %v493_v48 = vand.u32 2147483647, %v474_v22 }
 0x2e6   : > { %v516_v24 = vsub.f32 1.0, %v515_v23 }
 0x2e7   : > { %v496_v55 = vor.u32 1.1754944e-38, %v495_v45  ;;  %vm494_vm5 = vcmp.eq.f32.partialorder %v493_v48, 8.507059e+37 }
 0x2e8   : > { %v517_v26 = vmul.f32 %v901_v21, %v516_v24 }
 0x2ea   : > { %v518_v29 = vadd.f32 %v901_v21, %v517_v26 }
 0x2eb   : > { %v903_v25 = vpop.eup %902 }
 0x2ec   : > { %v485_v27 = vmul.f32 %v903_v25, %v474_v22  ;;  %v483_v28 = vpop.xlane.xlu0 %482  ;;  %v522_v34 = vsel %vm521_vm12, %v901_v21, %v518_v29  ;;  %vm490_vm14 = vweird.f32 %v903_v25 }
 0x2ed   : > { %904 = vrcp.f32 %v483_v28  ;;  %v527_v40 = vsel %vm524_vm13, %v526_v35, %v522_v34  ;;  %v540_v41 = vand.u32 2147483648, %v483_v28  ;;  %v538_v44 = vand.u32 2147483647, %v483_v28  ;;  %vm1274_vm1 = vmor %vm489_vm0, %vm490_vm14 }
 0x2ee   : > { %v486_v31 = vsub.f32 1.0, %v485_v27  ;;  %v528_v46 = vmul.f32 %v893_v8, %v527_v40  ;;  %vm534_vm2 = vweird.f32 %v483_v28 }
 0x2ef   : > { %v541_v51 = vor.u32 1.1754944e-38, %v540_v41  ;;  %vm539_vm4 = vcmp.eq.f32.partialorder %v538_v44, 8.507059e+37 }
 0x2f0   : > { %v487_v36 = vmul.f32 %v903_v25, %v486_v31  ;;  %v546_v57 = vpack.c.bf16 %v528_v46, %v528_v46 }
 0x2f2   : > { %v488_v42 = vadd.f32 %v903_v25, %v487_v36  ;;  %v582_v1 = vunpack.c.l.b16 %v546_v57 }
 0x2f3   : > { %v905_v33 = vpop.eup %904 }
 0x2f4   : > { %v530_v37 = vmul.f32 %v905_v33, %v483_v28  ;;  %v477_v38 = vpop.xlane.xlu0 %476  ;;  %vm535_vm15 = vweird.f32 %v905_v33  ;;  %v492_v54 = vsel %vm1274_vm1, %v903_v25, %v488_v42 }
 0x2f5   : > { %906 = vrcp.f32 %v477_v38  ;;  %vm536_vm3 = vmor %vm534_vm2, %vm535_vm15  ;;  %v510_v60 = vand.u32 2147483648, %v477_v38  ;;  %v497_v61 = vsel %vm494_vm5, %v496_v55, %v492_v54  ;;  %v508_v63 = vand.u32 2147483647, %v477_v38 }
 0x2f6   : > { %v531_v39 = vsub.f32 1.0, %v530_v37  ;;  %vm504_vm8 = vweird.f32 %v477_v38  ;;  %v498_v4 = vmul.f32 %v1265_v12, %v497_v61 }
 0x2f7   : > { %v511_v5 = vor.u32 1.1754944e-38, %v510_v60  ;;  %vm509_vm10 = vcmp.eq.f32.partialorder %v508_v63, 8.507059e+37 }
 0x2f8   : > { %v532_v43 = vmul.f32 %v905_v33, %v531_v39  ;;  %v544_v10 = vpack.c.bf16 %v498_v4, %v498_v4 }
 0x2fa   : > { %v533_v49 = vadd.f32 %v905_v33, %v532_v43  ;;  %v554_v13 = vunpack.c.l.b16 %v544_v10 }
 0x2fb   : > { %v907_v50 = vpop.eup %906 }
 0x2fc   : > { %v500_v52 = vmul.f32 %v907_v50, %v477_v38  ;;  %v537_v53 = vsel %vm536_vm3, %v905_v33, %v533_v49  ;;  %vm505_vm7 = vweird.f32 %v907_v50 }
 0x2fd   : > { %v542_v56 = vsel %vm539_vm4, %v541_v51, %v537_v53  ;;  %vm506_vm9 = vmor %vm504_vm8, %vm505_vm7 }
 0x2fe   : > { %v501_v58 = vsub.f32 1.0, %v500_v52  ;;  %v543_v59 = vmul.f32 %v897_v16, %v542_v56 }
 0x300   : > { %v502_v62 = vmul.f32 %v907_v50, %v501_v58  ;;  %v547_v0 = vpack.c.bf16 %v543_v59, %v543_v59 }
 0x302   : > { %v503_v2 = vadd.f32 %v907_v50, %v502_v62  ;;  %v583_v3 = vunpack.c.l.b16 %v547_v0 }
 0x304   : > { %v507_v6 = vsel %vm506_vm9, %v907_v50, %v503_v2  ;;  %v584_v7 = vpack.c.b16 %v583_v3, %v582_v1 }
 0x305   : > { %v512_v8 = vsel %vm509_vm10, %v511_v5, %v507_v6 }
 0x306   : > { %794 = vmatmul.msk.bf16.vlgmr.msra.gmra.mxu2 %vm447_vm6, %v584_v7  ;;  %v513_v9 = vmul.f32 %v1270_v18, %v512_v8 }
 0x308   : > { %v545_v11 = vpack.c.bf16 %v513_v9, %v513_v9 }
 0x30a   : > { %v555_v14 = vunpack.c.l.b16 %v545_v11 }
 0x30c   : > { %v556_v15 = vpack.c.b16 %v555_v14, %v554_v13 }
 0x30e   : > { %793 = vmatmul.msk.bf16.vlgmr.msra.gmra.mxu1 %vm447_vm6, %v556_v15 }
 0x389   : > { %v603_v16 = vpop.f32.mrf.mxu2 }
 0x38a   : > { %v614_v12 = vmin.f32 %v603_v16, 0.0  ;;  %vm610_vm11 = vcmp.gt.f32.partialorder %v603_v16, 0.0 }
 0x38b   : > { %v575_v17 = vpop.f32.mrf.mxu1 }
 0x38c   : > { %v620_v19 = vmul.f32 1.442695, %v614_v12  ;;  %v612_v20 = vmin.f32 %v575_v17, 0.0  ;;  %vm608_vm6 = vcmp.gt.f32.partialorder %v575_v17, 0.0 }
 0x38e   : > { %908 = vpow2.f32 %v620_v19  ;;  %v616_v21 = vmul.f32 1.442695, %v612_v20 }
 0x390   : > { %910 = vpow2.f32 %v616_v21 }
 0x391   : > { %v605_v22 = vpop.f32.mrf.mxu2 }
 0x392   : > { %v615_v18 = vmin.f32 %v605_v22, 0.0  ;;  %vm611_vm12 = vcmp.gt.f32.partialorder %v605_v22, 0.0 }
 0x393   : > { %v577_v23 = vpop.f32.mrf.mxu1 }
 0x394   : > { %v909_v24 = vpop.eup %908  ;;  %v622_v25 = vmul.f32 1.442695, %v615_v18  ;;  %v613_v26 = vmin.f32 %v577_v23, 0.0  ;;  %vm609_vm13 = vcmp.gt.f32.partialorder %v577_v23, 0.0 }
 0x395   : > { %v797_v27 = vadd.f32 -1.0, %v909_v24 }
 0x396   : > { %v911_v28 = vpop.eup %910  ;;  %912 = vpow2.f32 %v622_v25  ;;  %v618_v29 = vmul.f32 1.442695, %v613_v26 }
 0x397   : > { %v630_v30 = vsel %vm610_vm11, %v603_v16, %v797_v27  ;;  %v795_v31 = vadd.f32 -1.0, %v911_v28 }
 0x398   : > { %634 = vst [vmem:[%s250_s9 + $0x10] sm:$0xff] %v630_v30  ;;  %914 = vpow2.f32 %v618_v29 }
 0x399   : > { %v628_v32 = vsel %vm608_vm6, %v575_v17, %v795_v31 }
 0x39a   : > { %632 = vst [vmem:[%s250_s9] sm:$0xff] %v628_v32 }
 0x39c   : > { %v913_v33 = vpop.eup %912 }
 0x39d   : > { %v798_v34 = vadd.f32 -1.0, %v913_v33 }
 0x39e   : > { %v915_v35 = vpop.eup %914 }
 0x39f   : > { %v631_v36 = vsel %vm611_vm12, %v605_v22, %v798_v34  ;;  %v796_v37 = vadd.f32 -1.0, %v915_v35 }
 0x3a0   : > { %635 = vst [vmem:[%s250_s9 + $0x18] sm:$0xff] %v631_v36 }
 0x3a1   : > { %v629_v38 = vsel %vm609_vm13, %v577_v23, %v796_v37 }
 0x3a2   : > { %633 = vst [vmem:[%s250_s9 + $0x8] sm:$0xff] %v629_v38 }
 0x3a3   : > { %1033 = shalt.err (!%p1030_p10)
}
 0x3a4   : > { %s1090_s29 = smov 128   ;;  %s1091_s23 = smov 8  }
 0x3a5   : > { %825 = dma.vmem_to_hbm [thread:$0]  (%p1181_p5), %s651_s2, 512, %s653_s21, %s637_s16, %s1090_s29, %s1090_s29, %s1091_s23  }
 0x3a6 PF: > { %p845_p11 = scmp.ge.s32.totalorder %s1080_s15, 2  ;;  %s667_s7 = sand.u32 1, %s1068_s12  }
 0x3a7   : > { %s668_s10 = scalar_lea.sflag [#allocation4], %s667_s7 }
 0x3a8   : > { %p839_p12 = pnand %p845_p11, %p1147_p6 }
 0x3aa   : > { %p840_p13 = pneg %p839_p12 }
 0x3ac   : > { %1063 = dma.done.wait (%p840_p13), %s668_s10, 512  }
 0x3ad   : > { %1065 = vsyncadd (%p840_p13), %s668_s10, 4294966784  ;;  %s1333_s18 = sld [smem:[#allocation13_spill]]  ;;  %p19_p0 = scmp.ge.s32.totalorder %s1164_s26, 6  }
 0x3ae   : > { %s1334_s12 = smov %s1072_s13  ;;  %s1335_s13 = smov %s1076_s14 }
 0x3af   : > { %s1337_s15 = smov %s1164_s26  ;;  %21 = sbr.rel (!%p19_p0) target bundleno = 9 (0x9), region = 94 }
 0x3b3   : > { %s1336_s14 = smov %s1333_s18 }
 0x3b4   :  { %674 = vsyncpa [#allocation3], 1 }
 0x3b5   :  { %676 = vsyncpa [#allocation3 + $0x1], 1 }
 0x3b6   :  { %677 = vsyncpa [#allocation6], 1 }
 0x3b7   :  { %679 = vsyncpa [#allocation6 + $0x1], 1 }
 0x3b8   :  { %680 = vsyncpa [#allocation4], 1 }
 0x3b9   :  { %682 = vsyncpa [#allocation4 + $0x1], 1 }

</bundles_post_ra>
